<compile_context>
chip_gen: v7x
topology: tpu7x:2x2x1
jax: 0.10.0
libtpu: 0.0.40
codegen_flags: <defaults>
</compile_context>

<pallas_src>
import math

import jax
import jax.numpy as jnp
from jax.experimental import pallas as pl
from jax.experimental.pallas import tpu as pltpu

# ----------------------------- configuration --------------------------------
NUM_CLASS = 3
NUM_ANCHORS_PER_LOC = 2          # e.g. 1 size x 2 rotations
NUM_DIR_BINS = 2
CODE_SIZE = 7                    # ResidualCoder default (x, y, z, dx, dy, dz, r)
DIR_OFFSET = 0.78539             # pi / 4 (OpenPCDet config constant, truncated)
DIR_LIMIT_OFFSET = 0.0

MAX_TN = 8192                    # max lane tile along the flattened anchor axis
MIN_DIVISOR_TN = 2048            # smallest "good" divisor tile before padding

_PERIOD = 2.0 * math.pi / NUM_DIR_BINS


# ------------------------------ Pallas kernel --------------------------------
def _decode_kernel(anc_ref, box_ref, dir_ref, out_ref):
    """ResidualCoder.decode + direction-bin yaw correction on one lane tile.

    anc_ref: (8, TN)     f32 anchor slab: rows 0..6 = code, row 7 = sqrt(dxa^2+dya^2)
    box_ref: (B, 7, TN)  box regression residuals (native dtype)
    dir_ref: (B, 2, TN)  direction logits (native dtype)
    out_ref: (B, 7, TN)  decoded boxes, f32, channel-major
    """
    anc = anc_ref[...]                               # (8, TN) f32, batch-invariant
    diag = anc[7:8, :][None]                         # (1, 1, TN)
    dza = anc[5:6, :][None]                          # (1, 1, TN)

    # --- centers: x, y scale with diagonal; z scales with dza (slab ops) ---
    out_ref[:, 0:2, :] = (box_ref[:, 0:2, :].astype(jnp.float32) * diag
                          + anc[None, 0:2, :])
    out_ref[:, 2:3, :] = (box_ref[:, 2:3, :].astype(jnp.float32) * dza
                          + anc[None, 2:3, :])

    # --- sizes: exp(residual) * anchor size, one (B, 3, TN) slab ---
    out_ref[:, 3:6, :] = (jnp.exp(box_ref[:, 3:6, :].astype(jnp.float32))
                          * anc[None, 3:6, :])

    # --- yaw: residual + anchor yaw, then 2-bin direction correction ---
    rg = box_ref[:, 6:7, :].astype(jnp.float32) + anc[None, 6:7, :]
    # NUM_DIR_BINS == 2: argmax over bins is a single compare (first on ties),
    # done in f32 so bf16 heads tie-break exactly like the f32 reference.
    dir_hi = dir_ref[:, 1:2, :].astype(jnp.float32)
    dir_lo = dir_ref[:, 0:1, :].astype(jnp.float32)
    dir_idx = (dir_hi > dir_lo).astype(jnp.float32)
    # limit_period(rg - dir_offset, dir_limit_offset, period); divide by the
    # period (not multiply by its reciprocal) to bit-match the reference floor.
    val = rg - DIR_OFFSET
    dir_rot = val - jnp.floor(val / _PERIOD + DIR_LIMIT_OFFSET) * _PERIOD
    out_ref[:, 6:7, :] = dir_rot + DIR_OFFSET + _PERIOD * dir_idx


# ------------------------------ wrapper / glue --------------------------------
def _round_up(x, m):
    return (x + m - 1) // m * m


def _pick_tile(n128):
    """n128 = anchor count rounded up to a multiple of 128.
    Returns (TN, N_pad) with N_pad % TN == 0 and TN a multiple of 128."""
    if n128 <= MAX_TN:
        return n128, n128                      # single tile, no extra padding
    # prefer the largest divisor tile (no padding at all)
    t = MAX_TN
    while t >= MIN_DIVISOR_TN:
        if n128 % t == 0:
            return t, n128
        t -= 128
    # fall back: big tile + small tail padding (never collapse to TN=128)
    return MAX_TN, _round_up(n128, MAX_TN)


def _prepare_anchor_slab(anchors, n_pad):
    """(N, 7) anchors -> (8, n_pad) f32 channel-major slab, row 7 = diagonal.
    Batch-invariant; in a real head this is precomputed once at __init__."""
    n = anchors.shape[0]
    anc_t = anchors.astype(jnp.float32).T                                    # (7, N)
    if n_pad != n:
        anc_t = jnp.pad(anc_t, ((0, 0), (0, n_pad - n)))
    diag = jnp.sqrt(anc_t[3:4, :] ** 2 + anc_t[4:5, :] ** 2)                 # (1, n_pad)
    return jnp.concatenate([anc_t, diag], axis=0)                            # (8, n_pad)


def generate_predicted_boxes(cls_preds, box_preds, dir_cls_preds, anchors,
                             channel_major_inputs=False,
                             channel_major_output=True):
    """Mirrors AnchorHeadTemplate.generate_predicted_boxes.

    cls_preds:     (B, H, W, num_anchors_per_loc * num_class)    NHWC
    box_preds:     (B, H, W, num_anchors_per_loc * 7)            NHWC
    dir_cls_preds: (B, H, W, num_anchors_per_loc * num_dir_bins) NHWC
    anchors:       (N, 7) with N = H * W * num_anchors_per_loc

    If channel_major_inputs, box/dir preds are instead (B, 7, N) / (B, 2, N)
    (the head's native channel-first layout) and no input transpose happens.

    Returns:
      batch_cls_preds: (B, N, num_class) float32
      batch_box_preds: (B, 7, N) float32 channel-major (default), or
                       (B, N, 7) when channel_major_output=False (module layout)
    """
    B = cls_preds.shape[0]
    N = anchors.shape[0]
    TN, N_pad = _pick_tile(_round_up(N, 128))

    # pure reshape / layout glue (no decode compute).
    # TODO(synk): for bf16 heads, keep cls in bf16 end-to-end; the f32 cast here
    # only mirrors the module's `.float()`.
    batch_cls_preds = cls_preds.reshape(B, N, NUM_CLASS).astype(jnp.float32)

    if channel_major_inputs:
        box_t = box_preds.reshape(B, CODE_SIZE, N)
        dir_t = dir_cls_preds.reshape(B, NUM_DIR_BINS, N)
    else:
        # TODO(synk): have the head emit channel-first (its native NCHW conv
        # output) so these 7-minor transposes disappear; they dominate HBM
        # traffic for realistic anchor counts.
        box_t = box_preds.reshape(B, N, CODE_SIZE).transpose(0, 2, 1)        # (B, 7, N)
        dir_t = dir_cls_preds.reshape(B, N, NUM_DIR_BINS).transpose(0, 2, 1) # (B, 2, N)

    if N_pad != N:
        box_t = jnp.pad(box_t, ((0, 0), (0, 0), (0, N_pad - N)))
        dir_t = jnp.pad(dir_t, ((0, 0), (0, 0), (0, N_pad - N)))

    anc8 = _prepare_anchor_slab(anchors, N_pad)                              # (8, N_pad) f32

    out = pl.pallas_call(
        _decode_kernel,
        out_shape=jax.ShapeDtypeStruct((B, CODE_SIZE, N_pad), jnp.float32),
        grid_spec=pltpu.PrefetchScalarGridSpec(
            num_scalar_prefetch=0,
            grid=(N_pad // TN,),
            in_specs=[
                pl.BlockSpec((8, TN), lambda n: (0, n)),
                pl.BlockSpec((B, CODE_SIZE, TN), lambda n: (0, 0, n)),
                pl.BlockSpec((B, NUM_DIR_BINS, TN), lambda n: (0, 0, n)),
            ],
            out_specs=pl.BlockSpec((B, CODE_SIZE, TN), lambda n: (0, 0, n)),
        ),
        compiler_params=pltpu.CompilerParams(
            # disjoint output tiles -> safe to shard across both TCs on v7x
            dimension_semantics=("parallel",)),
    )(anc8, box_t, dir_t)                                                    # native dtypes in

    if N_pad != N:
        out = out[:, :, :N]

    if channel_major_output:
        return batch_cls_preds, out                                          # (B, 7, N)
    # TODO(synk): downstream NMS should consume channel-major directly; this
    # transpose only exists to honor the module's (B, N, 7) contract.
    return batch_cls_preds, out.transpose(0, 2, 1)                           # (B, N, 7)


# ------------------------- deterministic anchor setup ------------------------
def make_anchors(grid_h, grid_w, point_cloud_range):
    """Synthetic AnchorGenerator: grid centers x fixed size x 2 rotations.
    Returns (H*W*NUM_ANCHORS_PER_LOC, 7) float32, ordering [h, w, a, code]."""
    x_min, y_min, z_min, x_max, y_max, z_max = point_cloud_range
    xs = jnp.linspace(x_min, x_max, grid_w, dtype=jnp.float32)
    ys = jnp.linspace(y_min, y_max, grid_h, dtype=jnp.float32)
    yy, xx = jnp.meshgrid(ys, xs, indexing="ij")                             # (H, W)
    z_center = jnp.full_like(xx, -1.0)
    size = jnp.array([3.9, 1.6, 1.56], dtype=jnp.float32)                    # car anchor
    rots = jnp.array([0.0, math.pi / 2.0], dtype=jnp.float32)                # 2 rotations

    centers = jnp.stack([xx, yy, z_center], axis=-1)                         # (H, W, 3)
    centers = jnp.broadcast_to(centers[:, :, None, :],
                               (grid_h, grid_w, NUM_ANCHORS_PER_LOC, 3))
    sizes = jnp.broadcast_to(size[None, None, None, :],
                             (grid_h, grid_w, NUM_ANCHORS_PER_LOC, 3))
    rot = jnp.broadcast_to(rots[None, None, :, None],
                           (grid_h, grid_w, NUM_ANCHORS_PER_LOC, 1))
    anchors = jnp.concatenate([centers, sizes, rot], axis=-1)                # (H, W, A, 7)
    return anchors.reshape(-1, CODE_SIZE)


# --------------------------- pure-JAX reference -------------------------------
def _reference_decode(box_preds, dir_cls_preds, anchors):
    B = box_preds.shape[0]
    N = anchors.shape[0]
    t = box_preds.reshape(B, N, CODE_SIZE).astype(jnp.float32)
    d = dir_cls_preds.reshape(B, N, NUM_DIR_BINS).astype(jnp.float32)
    a = jnp.broadcast_to(anchors[None].astype(jnp.float32), (B, N, CODE_SIZE))

    xa, ya, za, dxa, dya, dza, ra = jnp.split(a, 7, axis=-1)
    xt, yt, zt, dxt, dyt, dzt, rt = jnp.split(t, 7, axis=-1)
    diagonal = jnp.sqrt(dxa ** 2 + dya ** 2)
    xg = xt * diagonal + xa
    yg = yt * diagonal + ya
    zg = zt * dza + za
    dxg = jnp.exp(dxt) * dxa
    dyg = jnp.exp(dyt) * dya
    dzg = jnp.exp(dzt) * dza
    rg = (rt + ra)[..., 0]

    dir_labels = jnp.argmax(d, axis=-1).astype(jnp.float32)
    period = 2.0 * math.pi / NUM_DIR_BINS
    val = rg - DIR_OFFSET
    dir_rot = val - jnp.floor(val / period + DIR_LIMIT_OFFSET) * period
    rg = dir_rot + DIR_OFFSET + period * dir_labels
    return jnp.concatenate([xg, yg, zg, dxg, dyg, dzg, rg[..., None]], axis=-1)


# ------------------------------------ main ------------------------------------
if __name__ == "__main__":
    B, H, W = 2, 16, 16
    point_cloud_range = (0.0, -40.0, -3.0, 70.4, 40.0, 1.0)

    key = jax.random.PRNGKey(0)
    k1, k2, k3 = jax.random.split(key, 3)
    cls_preds = jax.random.normal(
        k1, (B, H, W, NUM_ANCHORS_PER_LOC * NUM_CLASS), jnp.float32)
    box_preds = 0.1 * jax.random.normal(
        k2, (B, H, W, NUM_ANCHORS_PER_LOC * CODE_SIZE), jnp.float32)
    dir_cls_preds = jax.random.normal(
        k3, (B, H, W, NUM_ANCHORS_PER_LOC * NUM_DIR_BINS), jnp.float32)

    anchors = make_anchors(H, W, point_cloud_range)                           # (512, 7)
    N = anchors.shape[0]

    # perf-default path: channel-major (B, 7, N) output
    batch_cls_preds, box_cm = generate_predicted_boxes(
        cls_preds, box_preds, dir_cls_preds, anchors)
    jax.block_until_ready(box_cm)

    ref_boxes = _reference_decode(box_preds, dir_cls_preds, anchors)          # (B, N, 7)
    ref_cls = cls_preds.reshape(B, N, NUM_CLASS).astype(jnp.float32)
    assert batch_cls_preds.shape == (B, N, NUM_CLASS)
    assert box_cm.shape == (B, CODE_SIZE, N)
    assert jnp.max(jnp.abs(box_cm.transpose(0, 2, 1) - ref_boxes)) < 1e-5
    assert jnp.max(jnp.abs(batch_cls_preds - ref_cls)) == 0.0

    # module-contract layout path (B, N, 7)
    _, box_nm = generate_predicted_boxes(
        cls_preds, box_preds, dir_cls_preds, anchors, channel_major_output=False)
    assert box_nm.shape == (B, N, CODE_SIZE)
    assert jnp.max(jnp.abs(box_nm - ref_boxes)) < 1e-5

    # ragged anchor count: exercises the pad-to-tile path (no TN collapse)
    H2, W2 = 13, 10                                                           # N2 = 260 -> pad 384
    anchors2 = make_anchors(H2, W2, point_cloud_range)
    kk1, kk2, kk3 = jax.random.split(jax.random.PRNGKey(1), 3)
    cls2 = jax.random.normal(kk1, (B, H2, W2, NUM_ANCHORS_PER_LOC * NUM_CLASS), jnp.float32)
    box2 = 0.1 * jax.random.normal(kk2, (B, H2, W2, NUM_ANCHORS_PER_LOC * CODE_SIZE), jnp.float32)
    dir2 = jax.random.normal(kk3, (B, H2, W2, NUM_ANCHORS_PER_LOC * NUM_DIR_BINS), jnp.float32)
    _, box2_cm = generate_predicted_boxes(cls2, box2, dir2, anchors2)
    jax.block_until_ready(box2_cm)
    ref2 = _reference_decode(box2, dir2, anchors2)
    assert jnp.max(jnp.abs(box2_cm.transpose(0, 2, 1) - ref2)) < 1e-5

    print("KERNEL_OK")
</pallas_src>

<mosaic_0001>
module attributes {stable_mosaic.version = 11 : i64} {
  func.func @_decode_kernel(%arg0: i32, %arg1: memref<8x512xf32, #tpu.memory_space<vmem>>, %arg2: memref<2x7x512xf32, #tpu.memory_space<vmem>>, %arg3: memref<2x2x512xf32, #tpu.memory_space<vmem>>, %arg4: memref<2x7x512xf32, #tpu.memory_space<vmem>>) attributes {dimension_semantics = [#tpu.dimension_semantics<parallel>], iteration_bounds = array<i64: 1>, scalar_prefetch = 0 : i64, scratch_operands = 0 : i64, tpu.core_type = #tpu.core_type<tc>, window_params = [{transform_indices = @transform_0, window_bounds = array<i64: 8, 512>}, {transform_indices = @transform_1, window_bounds = array<i64: 2, 7, 512>}, {transform_indices = @transform_2, window_bounds = array<i64: 2, 2, 512>}, {transform_indices = @transform_3, window_bounds = array<i64: 2, 7, 512>}]} {
    %c0 = arith.constant 0 : index
    %c0_0 = arith.constant 0 : index
    %0 = vector.load %arg1[%c0, %c0_0] : memref<8x512xf32, #tpu.memory_space<vmem>>, vector<8x512xf32>
    %1 = vector.extract_strided_slice %0 {offsets = [7, 0], sizes = [1, 512], strides = [1, 1]} : vector<8x512xf32> to vector<1x512xf32>
    %2 = vector.shape_cast %1 : vector<1x512xf32> to vector<1x1x512xf32>
    %3 = vector.extract_strided_slice %0 {offsets = [5, 0], sizes = [1, 512], strides = [1, 1]} : vector<8x512xf32> to vector<1x512xf32>
    %4 = vector.shape_cast %3 : vector<1x512xf32> to vector<1x1x512xf32>
    %c0_1 = arith.constant 0 : index
    %c0_2 = arith.constant 0 : index
    %c0_3 = arith.constant 0 : index
    %5 = vector.load %arg2[%c0_1, %c0_2, %c0_3] : memref<2x7x512xf32, #tpu.memory_space<vmem>>, vector<2x2x512xf32>
    %6 = vector.broadcast %2 : vector<1x1x512xf32> to vector<2x2x512xf32>
    %7 = arith.mulf %5, %6 : vector<2x2x512xf32>
    %8 = vector.extract_strided_slice %0 {offsets = [0, 0], sizes = [2, 512], strides = [1, 1]} : vector<8x512xf32> to vector<2x512xf32>
    %9 = vector.shape_cast %8 : vector<2x512xf32> to vector<1x2x512xf32>
    %10 = vector.broadcast %9 : vector<1x2x512xf32> to vector<2x2x512xf32>
    %11 = arith.addf %7, %10 : vector<2x2x512xf32>
    %c0_4 = arith.constant 0 : index
    %c0_5 = arith.constant 0 : index
    %c0_6 = arith.constant 0 : index
    %12 = vector.load %arg4[%c0_4, %c0_5, %c0_6] : memref<2x7x512xf32, #tpu.memory_space<vmem>>, vector<2x2x512xf32>
    tpu.vector_store %arg4[%c0_4, %c0_5, %c0_6], %11 {strides = array<i32>} : memref<2x7x512xf32, #tpu.memory_space<vmem>>, vector<2x2x512xf32>,
    %c0_7 = arith.constant 0 : index
    %c2 = arith.constant 2 : index
    %c0_8 = arith.constant 0 : index
    %13 = vector.load %arg2[%c0_7, %c2, %c0_8] : memref<2x7x512xf32, #tpu.memory_space<vmem>>, vector<2x1x512xf32>
    %14 = vector.broadcast %4 : vector<1x1x512xf32> to vector<2x1x512xf32>
    %15 = arith.mulf %13, %14 : vector<2x1x512xf32>
    %16 = vector.extract_strided_slice %0 {offsets = [2, 0], sizes = [1, 512], strides = [1, 1]} : vector<8x512xf32> to vector<1x512xf32>
    %17 = vector.shape_cast %16 : vector<1x512xf32> to vector<1x1x512xf32>
    %18 = vector.broadcast %17 : vector<1x1x512xf32> to vector<2x1x512xf32>
    %19 = arith.addf %15, %18 : vector<2x1x512xf32>
    %c0_9 = arith.constant 0 : index
    %c2_10 = arith.constant 2 : index
    %c0_11 = arith.constant 0 : index
    %20 = vector.load %arg4[%c0_9, %c2_10, %c0_11] : memref<2x7x512xf32, #tpu.memory_space<vmem>>, vector<2x1x512xf32>
    tpu.vector_store %arg4[%c0_9, %c2_10, %c0_11], %19 {strides = array<i32>} : memref<2x7x512xf32, #tpu.memory_space<vmem>>, vector<2x1x512xf32>,
    %c0_12 = arith.constant 0 : index
    %c3 = arith.constant 3 : index
    %c0_13 = arith.constant 0 : index
    %21 = vector.load %arg2[%c0_12, %c3, %c0_13] : memref<2x7x512xf32, #tpu.memory_space<vmem>>, vector<2x3x512xf32>
    %22 = math.exp %21 : vector<2x3x512xf32>
    %23 = vector.extract_strided_slice %0 {offsets = [3, 0], sizes = [3, 512], strides = [1, 1]} : vector<8x512xf32> to vector<3x512xf32>
    %24 = vector.shape_cast %23 : vector<3x512xf32> to vector<1x3x512xf32>
    %25 = vector.broadcast %24 : vector<1x3x512xf32> to vector<2x3x512xf32>
    %26 = arith.mulf %22, %25 : vector<2x3x512xf32>
    %c0_14 = arith.constant 0 : index
    %c3_15 = arith.constant 3 : index
    %c0_16 = arith.constant 0 : index
    %27 = vector.load %arg4[%c0_14, %c3_15, %c0_16] : memref<2x7x512xf32, #tpu.memory_space<vmem>>, vector<2x3x512xf32>
    tpu.vector_store %arg4[%c0_14, %c3_15, %c0_16], %26 {strides = array<i32>} : memref<2x7x512xf32, #tpu.memory_space<vmem>>, vector<2x3x512xf32>,
    %c0_17 = arith.constant 0 : index
    %c6 = arith.constant 6 : index
    %c0_18 = arith.constant 0 : index
    %28 = vector.load %arg2[%c0_17, %c6, %c0_18] : memref<2x7x512xf32, #tpu.memory_space<vmem>>, vector<2x1x512xf32>
    %29 = vector.extract_strided_slice %0 {offsets = [6, 0], sizes = [1, 512], strides = [1, 1]} : vector<8x512xf32> to vector<1x512xf32>
    %30 = vector.shape_cast %29 : vector<1x512xf32> to vector<1x1x512xf32>
    %31 = vector.broadcast %30 : vector<1x1x512xf32> to vector<2x1x512xf32>
    %32 = arith.addf %28, %31 : vector<2x1x512xf32>
    %c0_19 = arith.constant 0 : index
    %c1 = arith.constant 1 : index
    %c0_20 = arith.constant 0 : index
    %33 = vector.load %arg3[%c0_19, %c1, %c0_20] : memref<2x2x512xf32, #tpu.memory_space<vmem>>, vector<2x1x512xf32>
    %c0_21 = arith.constant 0 : index
    %c0_22 = arith.constant 0 : index
    %c0_23 = arith.constant 0 : index
    %34 = vector.load %arg3[%c0_21, %c0_22, %c0_23] : memref<2x2x512xf32, #tpu.memory_space<vmem>>, vector<2x1x512xf32>
    %35 = arith.cmpf ogt, %33, %34 : vector<2x1x512xf32>
    %36 = arith.extui %35 : vector<2x1x512xi1> to vector<2x1x512xi32>
    %37 = arith.sitofp %36 : vector<2x1x512xi32> to vector<2x1x512xf32>
    %cst = arith.constant 7.853900e-01 : f32
    %38 = vector.broadcast %cst : f32 to vector<2x1x512xf32>
    %39 = arith.subf %32, %38 : vector<2x1x512xf32>
    %cst_24 = arith.constant 3.14159274 : f32
    %40 = vector.broadcast %cst_24 : f32 to vector<2x1x512xf32>
    %41 = arith.divf %39, %40 : vector<2x1x512xf32>
    %cst_25 = arith.constant 0.000000e+00 : f32
    %42 = vector.broadcast %cst_25 : f32 to vector<2x1x512xf32>
    %43 = arith.addf %41, %42 : vector<2x1x512xf32>
    %44 = math.floor %43 : vector<2x1x512xf32>
    %cst_26 = arith.constant 3.14159274 : f32
    %45 = vector.broadcast %cst_26 : f32 to vector<2x1x512xf32>
    %46 = arith.mulf %44, %45 : vector<2x1x512xf32>
    %47 = arith.subf %39, %46 : vector<2x1x512xf32>
    %cst_27 = arith.constant 7.853900e-01 : f32
    %48 = vector.broadcast %cst_27 : f32 to vector<2x1x512xf32>
    %49 = arith.addf %47, %48 : vector<2x1x512xf32>
    %cst_28 = arith.constant 3.14159274 : f32
    %50 = vector.broadcast %cst_28 : f32 to vector<2x1x512xf32>
    %51 = arith.mulf %50, %37 : vector<2x1x512xf32>
    %52 = arith.addf %49, %51 : vector<2x1x512xf32>
    %c0_29 = arith.constant 0 : index
    %c6_30 = arith.constant 6 : index
    %c0_31 = arith.constant 0 : index
    %53 = vector.load %arg4[%c0_29, %c6_30, %c0_31] : memref<2x7x512xf32, #tpu.memory_space<vmem>>, vector<2x1x512xf32>
    tpu.vector_store %arg4[%c0_29, %c6_30, %c0_31], %52 {strides = array<i32>} : memref<2x7x512xf32, #tpu.memory_space<vmem>>, vector<2x1x512xf32>,
    return
  }
  func.func @transform_0(%arg0: i32) -> (i32, i32) {
    %c0_i32 = arith.constant 0 : i32
    %c0_i32_0 = arith.constant 0 : i32
    return %c0_i32, %arg0 : i32, i32
  }
  func.func @transform_1(%arg0: i32) -> (i32, i32, i32) {
    %c0_i32 = arith.constant 0 : i32
    %c0_i32_0 = arith.constant 0 : i32
    %c0_i32_1 = arith.constant 0 : i32
    return %c0_i32, %c0_i32_0, %arg0 : i32, i32, i32
  }
  func.func @transform_2(%arg0: i32) -> (i32, i32, i32) {
    %c0_i32 = arith.constant 0 : i32
    %c0_i32_0 = arith.constant 0 : i32
    %c0_i32_1 = arith.constant 0 : i32
    return %c0_i32, %c0_i32_0, %arg0 : i32, i32, i32
  }
  func.func @transform_3(%arg0: i32) -> (i32, i32, i32) {
    %c0_i32 = arith.constant 0 : i32
    %c0_i32_0 = arith.constant 0 : i32
    %c0_i32_1 = arith.constant 0 : i32
    return %c0_i32, %c0_i32_0, %arg0 : i32, i32, i32
  }
}

</mosaic_0001>

<bundles_post_ra>
// kernel: tpu_custom_call.1
= control target key start
LH: loop header
LB: loop body
LE: loop exit
PB: predicated region body
PF: predicated region fallthrough
CT: control target
= control target key end

     0   :  { %v26_v0 = vlaneseq  ;;  %v274_v2 = vmov 1966171168   ;;  %s499_s0 = inlined_call_operand.vmem [shape: f32[8,512], index: 0, kind: input, shape index: {}]   ;;  %s500_s1 = inlined_call_operand.vmem [shape: f32[2,7,512], index: 1, kind: input, shape index: {}]   ;;  %s501_s3 = inlined_call_operand.vmem [shape: f32[2,7,512], index: 3, kind: output, shape index: {}]   ;;  %s502_s2 = inlined_call_operand.vmem [shape: f32[2,2,512], index: 2, kind: input, shape index: {}]  }
   0x1   :  { %v299_v1 = vld [vmem:[%s499_s0] sm:$0xff]  ;;  %v77_v3 = vunpack.c.l.s4 %v274_v2  ;;  %v304_v4 = vld [vmem:[%s499_s0 + $0x8] sm:$0xff]  ;;  %v310_v6 = vld [vmem:[%s499_s0 + $0x10] sm:$0xff] }
   0x2   :  { %v27_v5 = vshrl.u32 %v26_v0, 7  ;;  %v315_v8 = vld [vmem:[%s499_s0 + $0x18] sm:$0xff]  ;;  %v74_v9 = vcombine.high %v299_v1, %v304_v4  ;;  %v101_v10 = vcombine.low %v299_v1, %v304_v4  ;;  %v18_v11 = vld [vmem:[%s500_s1] sm:$0x3]  ;;  %v19_v13 = vld [vmem:[%s500_s1 + $0x8] sm:$0x3] }
   0x3   :  { %v78_v7 = vunpack.c.0.s8 %v77_v3  ;;  %v75_v14 = vcombine.high %v310_v6, %v315_v8  ;;  %v102_v15 = vcombine.low %v310_v6, %v315_v8  ;;  %v20_v17 = vld [vmem:[%s500_s1 + $0x10] sm:$0x3]  ;;  %v21_v18 = vld [vmem:[%s500_s1 + $0x18] sm:$0x3]  ;;  %v22_v19 = vld [vmem:[%s500_s1 + $0x20] sm:$0x3] }
   0x4   :  { %v28_v12 = vsub.s32 7, %v27_v5  ;;  %v23_v24 = vld [vmem:[%s500_s1 + $0x28] sm:$0x3]  ;;  %v24_v25 = vld [vmem:[%s500_s1 + $0x30] sm:$0x3]  ;;  %vm431_vm0 = vcmp.lt.s32.totalorder %v26_v0, 512 }
   0x5   :  { %v331_v16 = vsub.s32 %v78_v7, %v27_v5  ;;  %v25_v26 = vld [vmem:[%s500_s1 + $0x38] sm:$0x3]  ;;  %v139_v39 = vld [vmem:[%s500_s1] sm:$0x38]  ;;  %v140_v40 = vld [vmem:[%s500_s1 + $0x8] sm:$0x38] }
   0x6   :  { %v29_v20 = vrot.slane %v299_v1, %v28_v12  ;;  %v33_v21 = vrot.slane %v304_v4, %v28_v12  ;;  %v37_v22 = vrot.slane %v310_v6, %v28_v12  ;;  %v41_v23 = vrot.slane %v315_v8, %v28_v12  ;;  %v141_v45 = vld [vmem:[%s500_s1 + $0x10] sm:$0x38]  ;;  %v142_v46 = vld [vmem:[%s500_s1 + $0x18] sm:$0x38]  ;;  %v143_v53 = vld [vmem:[%s500_s1 + $0x20] sm:$0x38] }
   0x7   :  { %v82_v27 = vrot.slane %v74_v9, %v331_v16  ;;  %v89_v28 = vrot.slane %v75_v14, %v331_v16  ;;  %v109_v29 = vrot.slane %v101_v10, %v331_v16  ;;  %v116_v30 = vrot.slane %v102_v15, %v331_v16  ;;  %v237_v51 = vld [vmem:[%s500_s1 + $0x2] ss:$8 sm:$0xf]  ;;  %v144_v54 = vld [vmem:[%s500_s1 + $0x28] sm:$0x38] }
   0x8   :  { %v42_v31 = vmul.f32 %v29_v20, %v18_v11  ;;  %v43_v32 = vmul.f32 %v33_v21, %v19_v13  ;;  %v44_v33 = vmul.f32 %v37_v22, %v20_v17  ;;  %v45_v34 = vmul.f32 %v41_v23, %v21_v18  ;;  %v238_v52 = vld [vmem:[%s500_s1 + $0x22] ss:$8 sm:$0xf]  ;;  %v145_v59 = vld [vmem:[%s500_s1 + $0x30] sm:$0x38] }
   0x9   :  { %v46_v35 = vmul.f32 %v29_v20, %v22_v19  ;;  %v47_v36 = vmul.f32 %v33_v21, %v23_v24  ;;  %v48_v37 = vmul.f32 %v37_v22, %v24_v25  ;;  %v49_v38 = vmul.f32 %v41_v23, %v25_v26  ;;  %v146_v5 = vld [vmem:[%s500_s1 + $0x38] sm:$0x38]  ;;  %v241_v14 = vld [vmem:[%s500_s1 + $0x6] ss:$8 sm:$0xf] }
   0xa   :  { %v50_v41 = vadd.f32 %v42_v31, %v299_v1  ;;  %v51_v42 = vadd.f32 %v43_v32, %v304_v4  ;;  %v52_v43 = vadd.f32 %v44_v33, %v310_v6  ;;  %v53_v44 = vadd.f32 %v45_v34, %v315_v8  ;;  %v242_v15 = vld [vmem:[%s500_s1 + $0x26] ss:$8 sm:$0xf]  ;;  %v243_v22 = vld [vmem:[%s502_s2 + $0x1] ss:$2 sm:$0xf] }
   0xb   :  { %v54_v47 = vadd.f32 %v46_v35, %v299_v1  ;;  %v55_v48 = vadd.f32 %v47_v36, %v304_v4  ;;  %v56_v49 = vadd.f32 %v48_v37, %v310_v6  ;;  %v57_v50 = vadd.f32 %v49_v38, %v315_v8  ;;  %v199_v23 = vld [vmem:[%s502_s2] ss:$2 sm:$0xf]  ;;  %v244_v24 = vld [vmem:[%s502_s2 + $0x9] ss:$2 sm:$0xf] }
   0xc   :  { %58 = vst [vmem:[%s501_s3] sm:$0x3] %v50_v41  ;;  %59 = vst [vmem:[%s501_s3 + $0x8] sm:$0x3] %v51_v42  ;;  %v90_v55 = vcombine.high %v82_v27, %v89_v28  ;;  %v117_v56 = vcombine.low %v109_v29, %v116_v30  ;;  %v147_v57 = vmul.f32 1.442695, %v139_v39  ;;  %v183_v62 = vcombine.low %v82_v27, %v89_v28 }
   0xd   :  { %60 = vst [vmem:[%s501_s3 + $0x10] sm:$0x3] %v52_v43  ;;  %61 = vst [vmem:[%s501_s3 + $0x18] sm:$0x3] %v53_v44  ;;  %v149_v58 = vmul.f32 1.442695, %v140_v40  ;;  %vm202_vm1 = vcmp.gt.f32.partialorder %v243_v22, %v199_v23 }
   0xe   :  { %62 = vst [vmem:[%s501_s3 + $0x20] sm:$0x3] %v54_v47  ;;  %63 = vst [vmem:[%s501_s3 + $0x28] sm:$0x3] %v55_v48  ;;  %v151_v60 = vmul.f32 1.442695, %v141_v45  ;;  %v97_v63 = vrot.slane %v90_v55, %v331_v16  ;;  %v124_v2 = vrot.slane %v117_v56, %v331_v16  ;;  %258 = vpow2.f32 %v147_v57 }
   0xf   :  { %64 = vst [vmem:[%s501_s3 + $0x30] sm:$0x3] %v56_v49  ;;  %65 = vst [vmem:[%s501_s3 + $0x38] sm:$0x3] %v57_v50  ;;  %v153_v61 = vmul.f32 1.442695, %v142_v46  ;;  %260 = vpow2.f32 %v149_v58  ;;  %v190_v10 = vrot.slane %v183_v62, %v331_v16 }
  0x10   :  { %v155_v3 = vmul.f32 1.442695, %v143_v53  ;;  %v157_v7 = vmul.f32 1.442695, %v144_v54  ;;  %v159_v9 = vmul.f32 1.442695, %v145_v59  ;;  %v99_v11 = vmul.f32 %v237_v51, %v97_v63 }
  0x11   :  { %v125_v12 = vcombine.high %v124_v2, %v124_v2  ;;  %v100_v13 = vmul.f32 %v238_v52, %v97_v63  ;;  %262 = vpow2.f32 %v151_v60  ;;  %v161_v18 = vmul.f32 1.442695, %v146_v5  ;;  %v245_v25 = vld [vmem:[%s502_s2 + $0x8] ss:$2 sm:$0xf] }
  0x12   :  { %264 = vpow2.f32 %v153_v61  ;;  %v191_v16 = vcombine.high %v190_v10, %v190_v10  ;;  %vm203_vm2 = vcmp.gt.f32.partialorder %v244_v24, %v245_v25  ;;  %v275_v33 = vmov 0.0  }
  0x13   :  { %v127_v19 = vadd.f32 %v125_v12, %v99_v11  ;;  %v128_v20 = vadd.f32 %v125_v12, %v100_v13  ;;  %266 = vpow2.f32 %v155_v3  ;;  %v246_v34 = vsel %vm202_vm1, 1.0, %v275_v33 }
  0x14   :  { %268 = vpow2.f32 %v157_v7  ;;  %v193_v21 = vadd.f32 %v241_v14, %v191_v16  ;;  %v194_v0 = vadd.f32 %v242_v15, %v191_v16  ;;  %v247_v39 = vsel %vm203_vm2, 1.0, %v275_v33 }
  0x15   :  { %239 = vst.msk [vmem:[%s501_s3 + $0x2] ss:$8 sm:$0xf] %vm431_vm0, %v127_v19  ;;  %240 = vst.msk [vmem:[%s501_s3 + $0x22] ss:$8 sm:$0xf] %vm431_vm0, %v128_v20  ;;  %270 = vpow2.f32 %v159_v9 }
  0x16   :  { %272 = vpow2.f32 %v161_v18  ;;  %v248_v26 = vadd.f32 -0.78539, %v193_v21  ;;  %v249_v27 = vadd.f32 -0.78539, %v194_v0  ;;  %v223_v46 = vmul.f32 3.1415927, %v246_v34 }
  0x17   :  { %v224_v51 = vmul.f32 3.1415927, %v247_v39 }
  0x18   :  { %v211_v28 = vmul.f32 0.31830987, %v248_v26  ;;  %v212_v29 = vmul.f32 0.31830987, %v249_v27  ;;  %v259_v30 = vpop.eup %258 }
  0x19   :  { %v261_v31 = vpop.eup %260  ;;  %v163_v32 = vmul.f32 %v259_v30, %v299_v1 }
  0x1a   :  { %v215_v35 = vfloor.f32 %v211_v28  ;;  %v216_v36 = vfloor.f32 %v212_v29  ;;  %v164_v38 = vmul.f32 %v261_v31, %v304_v4 }
  0x1b   :  { %v263_v37 = vpop.eup %262  ;;  %171 = vst [vmem:[%s501_s3] sm:$0x38] %v163_v32 }
  0x1c   :  { %v265_v40 = vpop.eup %264  ;;  %v165_v41 = vmul.f32 %v263_v37, %v310_v6  ;;  %v217_v42 = vmul.f32 3.1415927, %v215_v35  ;;  %v218_v43 = vmul.f32 3.1415927, %v216_v36  ;;  %172 = vst [vmem:[%s501_s3 + $0x8] sm:$0x38] %v164_v38 }
  0x1d   :  { %v267_v44 = vpop.eup %266  ;;  %v166_v45 = vmul.f32 %v265_v40, %v315_v8 }
  0x1e   :  { %v269_v47 = vpop.eup %268  ;;  %173 = vst [vmem:[%s501_s3 + $0x10] sm:$0x38] %v165_v41  ;;  %v167_v48 = vmul.f32 %v267_v44, %v299_v1  ;;  %v219_v49 = vsub.f32 %v248_v26, %v217_v42  ;;  %v220_v50 = vsub.f32 %v249_v27, %v218_v43 }
  0x1f   :  { %v271_v52 = vpop.eup %270  ;;  %174 = vst [vmem:[%s501_s3 + $0x18] sm:$0x38] %v166_v45  ;;  %v168_v53 = vmul.f32 %v269_v47, %v304_v4 }
  0x20   :  { %v273_v54 = vpop.eup %272  ;;  %175 = vst [vmem:[%s501_s3 + $0x20] sm:$0x38] %v167_v48  ;;  %v169_v55 = vmul.f32 %v271_v52, %v310_v6  ;;  %v221_v56 = vadd.f32 0.78539, %v219_v49  ;;  %v222_v57 = vadd.f32 0.78539, %v220_v50 }
  0x21   :  { %176 = vst [vmem:[%s501_s3 + $0x28] sm:$0x38] %v168_v53  ;;  %v170_v1 = vmul.f32 %v273_v54, %v315_v8 }
  0x22   :  { %177 = vst [vmem:[%s501_s3 + $0x30] sm:$0x38] %v169_v55  ;;  %v225_v4 = vadd.f32 %v223_v46, %v221_v56  ;;  %v226_v58 = vadd.f32 %v224_v51, %v222_v57 }
  0x23   :  { %178 = vst [vmem:[%s501_s3 + $0x38] sm:$0x38] %v170_v1 }
  0x24   :  { %250 = vst.msk [vmem:[%s501_s3 + $0x6] ss:$8 sm:$0xf] %vm431_vm0, %v225_v4  ;;  %251 = vst.msk [vmem:[%s501_s3 + $0x26] ss:$8 sm:$0xf] %vm431_vm0, %v226_v58 }

</bundles_post_ra>
